<compile_context>
chip_gen: v6e
topology: v6e:2x2x1
jax: 0.10.0
libtpu: 0.0.40
codegen_flags: <defaults>
</compile_context>

<pallas_src>
import math

import jax
import jax.numpy as jnp
from jax import lax
from jax.experimental import pallas as pl
from jax.experimental.pallas import tpu as pltpu

EPS = 2.2204e-16

_LANES = 128
_TARGET_TILE_BYTES = 8 * 1024 * 1024   # ~8 MiB per input tile (16K f32 rows)
_NUM_CORE_SLICES = 2                   # leading "parallel" axis (v7x megacore)
_MAX_ACC_ROWS = 2048                   # guard for awkward channel counts


def _make_kernel(*, block_rows, acc_rows, n_par, steps_per_slice, rows_valid,
                 needs_mask):
    """Per-step fold of a (block_rows, 128) tile onto a (3*acc_rows, 128) acc."""
    A = acc_rows
    unit = n_par * A                   # rows folded per fori-loop iteration
    n_iters = block_rows // unit

    def kernel(x_ref, y_ref, o_ref):
        i = pl.program_id(1)

        if needs_mask:
            # Logical (unclamped) block index -> first globally valid row of
            # this block.  Duplicated (clamped) steps get rem <= 0 -> all-zero.
            logical = pl.program_id(0) * steps_per_slice + i
            base_row = logical * block_rows
            row_iota = lax.broadcasted_iota(jnp.int32, (A, _LANES), 0)

        def load(r, off):
            idx = pl.multiple_of(r + off, 8)      # sublane-aligned dynamic slice
            x = x_ref[pl.ds(idx, A), :].astype(jnp.float32)
            y = y_ref[pl.ds(idx, A), :].astype(jnp.float32)
            if needs_mask:
                rem = rows_valid - base_row - (r + off)
                keep = row_iota < rem
                x = jnp.where(keep, x, 0.0)
                y = jnp.where(keep, y, 0.0)
            return x, y

        def body(j, carry):
            accs = list(carry)
            r = j * unit
            for k in range(n_par):                # static unroll -> ILP partials
                x, y = load(r, k * A)
                accs[3 * k + 0] = accs[3 * k + 0] + x * y
                accs[3 * k + 1] = accs[3 * k + 1] + x * x
                accs[3 * k + 2] = accs[3 * k + 2] + y * y
            return tuple(accs)

        zero = jnp.zeros((A, _LANES), jnp.float32)
        accs = lax.fori_loop(0, n_iters, body, (zero,) * (3 * n_par))

        xy, xx, yy = accs[0], accs[1], accs[2]
        for k in range(1, n_par):
            xy = xy + accs[3 * k + 0]
            xx = xx + accs[3 * k + 1]
            yy = yy + accs[3 * k + 2]

        # Touch the resident output block once per grid step.
        @pl.when(i == 0)
        def _():
            o_ref[0 * A:1 * A, :] = xy
            o_ref[1 * A:2 * A, :] = xx
            o_ref[2 * A:3 * A, :] = yy

        @pl.when(i > 0)
        def _():
            o_ref[0 * A:1 * A, :] += xy
            o_ref[1 * A:2 * A, :] += xx
            o_ref[2 * A:3 * A, :] += yy

    return kernel


def _channel_sums_kernel(x_flat, y_flat, C, acc_rows, tile_bytes):
    """x_flat, y_flat: flat prefixes whose length is a multiple of acc_rows*128.

    Returns (3, C) float32: per-channel [sum(x*y), sum(x*x), sum(y*y)].
    """
    M = x_flat.shape[0]
    rows = M // _LANES                             # multiple of acc_rows
    itemsize = jnp.dtype(x_flat.dtype).itemsize

    # ILP width: keep >= ~8 vregs of accumulators in flight per product while
    # bounding the fori-loop carry to <= ~24 vregs.
    n_par = max(1, min(rows // acc_rows, 64 // acc_rows))
    unit = n_par * acc_rows

    target_rows = max(unit, tile_bytes // (_LANES * itemsize))
    block_rows = min((rows // unit) * unit, (target_rows // unit) * unit)
    total_steps = -(-rows // block_rows)

    num_slices = _NUM_CORE_SLICES if total_steps >= _NUM_CORE_SLICES else 1
    if num_slices > 1 and total_steps % num_slices:
        # Prefer a step count that is a multiple of num_slices (no duplicated,
        # fully-masked surplus step) when a modest block shrink achieves it.
        want = -(-total_steps // num_slices) * num_slices
        per_step = -(-rows // want)
        cand = -(-per_step // unit) * unit
        if (-(-rows // cand)) % num_slices == 0:
            block_rows = cand
            total_steps = -(-rows // block_rows)
    steps_per_slice = -(-total_steps // num_slices)
    has_dup = (num_slices * steps_per_slice != total_steps)
    needs_mask = has_dup or (total_steps * block_rows != rows)

    x2 = x_flat.reshape(rows, _LANES)
    y2 = y_flat.reshape(rows, _LANES)

    def in_map(p, i):
        b = p * steps_per_slice + i
        if has_dup:
            # Surplus steps re-read the (already resident) last block; their
            # contribution is masked to zero inside the kernel.
            b = jnp.minimum(b, total_steps - 1)
        return (b, 0)

    kernel = _make_kernel(block_rows=block_rows, acc_rows=acc_rows,
                          n_par=n_par, steps_per_slice=steps_per_slice,
                          rows_valid=rows, needs_mask=needs_mask)

    out_block = 3 * acc_rows
    tile_b = block_rows * _LANES * itemsize
    out_b = out_block * _LANES * 4
    # 2 inputs x 2 pipeline buffers + resident output + margin, capped under
    # v7x's 64 MiB physical VMEM (v5e/v6e have 128 MiB, no issue).
    vmem_limit = int(min(48 * 2**20,
                         max(32 * 2**20, 4 * tile_b + 2 * out_b + 12 * 2**20)))

    cost = pl.CostEstimate(flops=6 * M, transcendentals=0,
                           bytes_accessed=2 * M * itemsize + num_slices * out_b)

    out = pl.pallas_call(
        kernel,
        out_shape=jax.ShapeDtypeStruct((num_slices, out_block, _LANES),
                                       jnp.float32),
        grid_spec=pltpu.PrefetchScalarGridSpec(
            num_scalar_prefetch=0,
            grid=(num_slices, steps_per_slice),
            in_specs=[
                pl.BlockSpec((block_rows, _LANES), in_map),
                pl.BlockSpec((block_rows, _LANES), in_map),
            ],
            out_specs=pl.BlockSpec((None, out_block, _LANES),
                                   lambda p, i: (p, 0, 0)),
        ),
        compiler_params=pltpu.CompilerParams(
            dimension_semantics=("parallel", "arbitrary"),
            vmem_limit_bytes=vmem_limit),
        cost_estimate=cost,
    )(x2, y2)

    # Tiny epilogue: combine per-core partials, then per-channel extraction.
    acc = jnp.sum(out, axis=0)                            # (3*acc_rows, 128)
    acc = acc.reshape(3, acc_rows * _LANES)
    # Accumulator slot q holds only positions p with p % C == q % C (the block
    # start of every folded group is a multiple of acc_rows*128, which is a
    # multiple of C), so grouping slots by C gives the per-channel sums.
    per_channel = acc.reshape(3, (acc_rows * _LANES) // C, C).sum(axis=1)
    return per_channel


def loss_sam2(im1, im2, eps=EPS, *, tile_bytes=_TARGET_TILE_BYTES):
    """Pallas-backed equivalent of Loss_SAM2.forward.  im1, im2: (H, W, C)."""
    assert im1.shape == im2.shape
    H, W, C = im1.shape
    M = H * W * C
    x = jnp.reshape(im1, (M,))          # natural memory order, no transpose
    y = jnp.reshape(im2, (M,))

    # Smallest sublane count (multiple of 8) such that acc_rows*128 % C == 0.
    acc_rows = 8 * (C // math.gcd(C, 8 * _LANES))
    period = acc_rows * _LANES
    m_main = (M // period) * period if acc_rows <= _MAX_ACC_ROWS else 0

    if m_main > 0:
        sums = _channel_sums_kernel(x[:m_main], y[:m_main], C, acc_rows,
                                    tile_bytes)
        mole, n1sq, n2sq = sums[0], sums[1], sums[2]
    else:
        # TODO(synk): channel counts with a huge factor coprime to 1024 (or
        # inputs smaller than one accumulator period) fall back to plain XLA.
        mole = jnp.zeros((C,), jnp.float32)
        n1sq = jnp.zeros((C,), jnp.float32)
        n2sq = jnp.zeros((C,), jnp.float32)

    if m_main < M:
        # Ragged tail: < acc_rows*128 elements, length a multiple of C and
        # channel-phase aligned.  A few plain-XLA ops; no padding of inputs.
        xt = x[m_main:].astype(jnp.float32).reshape(-1, C)
        yt = y[m_main:].astype(jnp.float32).reshape(-1, C)
        mole = mole + jnp.sum(xt * yt, axis=0)
        n1sq = n1sq + jnp.sum(xt * xt, axis=0)
        n2sq = n2sq + jnp.sum(yt * yt, axis=0)

    deno = jnp.sqrt(n1sq) * jnp.sqrt(n2sq)
    ratio = jnp.clip((mole + eps) / (deno + eps), -1.0, 1.0)
    sam = jnp.rad2deg(jnp.arccos(ratio))          # O(C) finalization in JAX
    return jnp.mean(sam)


def _reference(im1, im2, eps=EPS):
    """Pure-jnp reference mirroring the numpy code in the PyTorch module."""
    H, W, C = im1.shape
    a = jnp.reshape(im1, (H * W, C)).T.astype(jnp.float32)
    b = jnp.reshape(im2, (H * W, C)).T.astype(jnp.float32)
    mole = jnp.sum(a * b, axis=1)
    deno = jnp.sqrt(jnp.sum(a * a, axis=1)) * jnp.sqrt(jnp.sum(b * b, axis=1))
    sam = jnp.rad2deg(jnp.arccos(jnp.clip((mole + eps) / (deno + eps),
                                          -1.0, 1.0)))
    return jnp.mean(sam)


if __name__ == "__main__":
    key = jax.random.PRNGKey(0)

    # Small cases exercising every compiled variant of the kernel:
    #  (16,16,4): single step, single slice, no mask
    #  (64,64,3): multi-group fold (n_par=2), no mask
    #  (72,72,3): 2 slices, partial last block + row mask + jnp tail
    #  (80,80,3) w/ tiny tiles: 2 slices, clamped duplicate (fully masked) step
    cases = [
        ((16, 16, 4), {}),
        ((64, 64, 3), {}),
        ((72, 72, 3), {}),
        ((80, 80, 3), dict(tile_bytes=48 * _LANES * 4)),
    ]
    for shape, kwargs in cases:
        key, k1, k2 = jax.random.split(key, 3)
        im1 = jax.random.uniform(k1, shape, dtype=jnp.float32)
        im2 = jax.random.uniform(k2, shape, dtype=jnp.float32)
        out = jax.block_until_ready(loss_sam2(im1, im2, **kwargs))
        ref = jax.block_until_ready(_reference(im1, im2))
        assert abs(float(out) - float(ref)) < 2e-3, (shape, float(out),
                                                     float(ref))
    print("KERNEL_OK")
</pallas_src>

<mosaic_0001>
module attributes {stable_mosaic.version = 11 : i64} {
  func.func @kernel(%arg0: i32, %arg1: i32, %arg2: memref<8x128xf32, #tpu.memory_space<vmem>>, %arg3: memref<8x128xf32, #tpu.memory_space<vmem>>, %arg4: memref<1x24x128xf32, #tpu.memory_space<vmem>>) attributes {dimension_semantics = [#tpu.dimension_semantics<parallel>, #tpu.dimension_semantics<arbitrary>], iteration_bounds = array<i64: 1, 1>, scalar_prefetch = 0 : i64, scratch_operands = 0 : i64, tpu.core_type = #tpu.core_type<tc>, window_params = [{transform_indices = @transform_0, window_bounds = array<i64: 8, 128>}, {transform_indices = @transform_1, window_bounds = array<i64: 8, 128>}, {transform_indices = @transform_2, window_bounds = array<i64: 1, 24, 128>}]} {
    %cst = arith.constant 0.000000e+00 : f32
    %0 = vector.broadcast %cst : f32 to vector<8x128xf32>
    %c0_i32 = arith.constant 0 : i32
    %c8_i32 = arith.constant 8 : i32
    %1 = arith.muli %c0_i32, %c8_i32 : i32
    %c0_i32_0 = arith.constant 0 : i32
    %2 = arith.addi %1, %c0_i32_0 : i32
    %3 = tpu.assume_multiple %2, 8 : i32
    %4 = arith.index_cast %3 : i32 to index
    %c0 = arith.constant 0 : index
    %5 = vector.load %arg2[%4, %c0] : memref<8x128xf32, #tpu.memory_space<vmem>>, vector<8x128xf32>
    %6 = arith.index_cast %3 : i32 to index
    %c0_1 = arith.constant 0 : index
    %7 = vector.load %arg3[%6, %c0_1] : memref<8x128xf32, #tpu.memory_space<vmem>>, vector<8x128xf32>
    %8 = arith.mulf %5, %7 : vector<8x128xf32>
    %9 = arith.addf %0, %8 : vector<8x128xf32>
    %10 = arith.mulf %5, %5 : vector<8x128xf32>
    %11 = arith.addf %0, %10 : vector<8x128xf32>
    %12 = arith.mulf %7, %7 : vector<8x128xf32>
    %13 = arith.addf %0, %12 : vector<8x128xf32>
    %c1_i32 = arith.constant 1 : i32
    %c0_i32_2 = arith.constant 0 : i32
    %14 = arith.cmpi eq, %arg1, %c0_i32_2 : i32
    %15 = arith.extui %14 : i1 to i32
    %c0_i32_3 = arith.constant 0 : i32
    %16 = arith.cmpi ne, %15, %c0_i32_3 : i32
    scf.if %16 {
      %c0_6 = arith.constant 0 : index
      %c0_7 = arith.constant 0 : index
      %c0_8 = arith.constant 0 : index
      %20 = vector.load %arg4[%c0_6, %c0_7, %c0_8] : memref<1x24x128xf32, #tpu.memory_space<vmem>>, vector<1x8x128xf32>
      %21 = vector.shape_cast %20 : vector<1x8x128xf32> to vector<8x128xf32>
      %22 = vector.shape_cast %9 : vector<8x128xf32> to vector<1x8x128xf32>
      tpu.vector_store %arg4[%c0_6, %c0_7, %c0_8], %22 {strides = array<i32>} : memref<1x24x128xf32, #tpu.memory_space<vmem>>, vector<1x8x128xf32>,
      %c0_9 = arith.constant 0 : index
      %c8 = arith.constant 8 : index
      %c0_10 = arith.constant 0 : index
      %23 = vector.load %arg4[%c0_9, %c8, %c0_10] : memref<1x24x128xf32, #tpu.memory_space<vmem>>, vector<1x8x128xf32>
      %24 = vector.shape_cast %23 : vector<1x8x128xf32> to vector<8x128xf32>
      %25 = vector.shape_cast %11 : vector<8x128xf32> to vector<1x8x128xf32>
      tpu.vector_store %arg4[%c0_9, %c8, %c0_10], %25 {strides = array<i32>} : memref<1x24x128xf32, #tpu.memory_space<vmem>>, vector<1x8x128xf32>,
      %c0_11 = arith.constant 0 : index
      %c16 = arith.constant 16 : index
      %c0_12 = arith.constant 0 : index
      %26 = vector.load %arg4[%c0_11, %c16, %c0_12] : memref<1x24x128xf32, #tpu.memory_space<vmem>>, vector<1x8x128xf32>
      %27 = vector.shape_cast %26 : vector<1x8x128xf32> to vector<8x128xf32>
      %28 = vector.shape_cast %13 : vector<8x128xf32> to vector<1x8x128xf32>
      tpu.vector_store %arg4[%c0_11, %c16, %c0_12], %28 {strides = array<i32>} : memref<1x24x128xf32, #tpu.memory_space<vmem>>, vector<1x8x128xf32>,
    } else {
    }
    %c0_i32_4 = arith.constant 0 : i32
    %17 = arith.cmpi sgt, %arg1, %c0_i32_4 : i32
    %18 = arith.extui %17 : i1 to i32
    %c0_i32_5 = arith.constant 0 : i32
    %19 = arith.cmpi ne, %18, %c0_i32_5 : i32
    scf.if %19 {
      %c0_6 = arith.constant 0 : index
      %c0_7 = arith.constant 0 : index
      %c0_8 = arith.constant 0 : index
      %20 = vector.load %arg4[%c0_6, %c0_7, %c0_8] : memref<1x24x128xf32, #tpu.memory_space<vmem>>, vector<1x8x128xf32>
      %21 = vector.shape_cast %20 : vector<1x8x128xf32> to vector<8x128xf32>
      %22 = arith.addf %21, %9 : vector<8x128xf32>
      %c0_9 = arith.constant 0 : index
      %c0_10 = arith.constant 0 : index
      %c0_11 = arith.constant 0 : index
      %23 = vector.load %arg4[%c0_9, %c0_10, %c0_11] : memref<1x24x128xf32, #tpu.memory_space<vmem>>, vector<1x8x128xf32>
      %24 = vector.shape_cast %23 : vector<1x8x128xf32> to vector<8x128xf32>
      %25 = vector.shape_cast %22 : vector<8x128xf32> to vector<1x8x128xf32>
      tpu.vector_store %arg4[%c0_9, %c0_10, %c0_11], %25 {strides = array<i32>} : memref<1x24x128xf32, #tpu.memory_space<vmem>>, vector<1x8x128xf32>,
      %c0_12 = arith.constant 0 : index
      %c8 = arith.constant 8 : index
      %c0_13 = arith.constant 0 : index
      %26 = vector.load %arg4[%c0_12, %c8, %c0_13] : memref<1x24x128xf32, #tpu.memory_space<vmem>>, vector<1x8x128xf32>
      %27 = vector.shape_cast %26 : vector<1x8x128xf32> to vector<8x128xf32>
      %28 = arith.addf %27, %11 : vector<8x128xf32>
      %c0_14 = arith.constant 0 : index
      %c8_15 = arith.constant 8 : index
      %c0_16 = arith.constant 0 : index
      %29 = vector.load %arg4[%c0_14, %c8_15, %c0_16] : memref<1x24x128xf32, #tpu.memory_space<vmem>>, vector<1x8x128xf32>
      %30 = vector.shape_cast %29 : vector<1x8x128xf32> to vector<8x128xf32>
      %31 = vector.shape_cast %28 : vector<8x128xf32> to vector<1x8x128xf32>
      tpu.vector_store %arg4[%c0_14, %c8_15, %c0_16], %31 {strides = array<i32>} : memref<1x24x128xf32, #tpu.memory_space<vmem>>, vector<1x8x128xf32>,
      %c0_17 = arith.constant 0 : index
      %c16 = arith.constant 16 : index
      %c0_18 = arith.constant 0 : index
      %32 = vector.load %arg4[%c0_17, %c16, %c0_18] : memref<1x24x128xf32, #tpu.memory_space<vmem>>, vector<1x8x128xf32>
      %33 = vector.shape_cast %32 : vector<1x8x128xf32> to vector<8x128xf32>
      %34 = arith.addf %33, %13 : vector<8x128xf32>
      %c0_19 = arith.constant 0 : index
      %c16_20 = arith.constant 16 : index
      %c0_21 = arith.constant 0 : index
      %35 = vector.load %arg4[%c0_19, %c16_20, %c0_21] : memref<1x24x128xf32, #tpu.memory_space<vmem>>, vector<1x8x128xf32>
      %36 = vector.shape_cast %35 : vector<1x8x128xf32> to vector<8x128xf32>
      %37 = vector.shape_cast %34 : vector<8x128xf32> to vector<1x8x128xf32>
      tpu.vector_store %arg4[%c0_19, %c16_20, %c0_21], %37 {strides = array<i32>} : memref<1x24x128xf32, #tpu.memory_space<vmem>>, vector<1x8x128xf32>,
    } else {
    }
    return
  }
  func.func @transform_0(%arg0: i32, %arg1: i32) -> (i32, i32) {
    %c1_i32 = arith.constant 1 : i32
    %0 = arith.muli %arg0, %c1_i32 : i32
    %1 = arith.addi %0, %arg1 : i32
    %c0_i32 = arith.constant 0 : i32
    %c0_i32_0 = arith.constant 0 : i32
    return %1, %c0_i32 : i32, i32
  }
  func.func @transform_1(%arg0: i32, %arg1: i32) -> (i32, i32) {
    %c1_i32 = arith.constant 1 : i32
    %0 = arith.muli %arg0, %c1_i32 : i32
    %1 = arith.addi %0, %arg1 : i32
    %c0_i32 = arith.constant 0 : i32
    %c0_i32_0 = arith.constant 0 : i32
    return %1, %c0_i32 : i32, i32
  }
  func.func @transform_2(%arg0: i32, %arg1: i32) -> (i32, i32, i32) {
    %c0_i32 = arith.constant 0 : i32
    %c0_i32_0 = arith.constant 0 : i32
    %c0_i32_1 = arith.constant 0 : i32
    return %arg0, %c0_i32, %c0_i32_0 : i32, i32, i32
  }
}

</mosaic_0001>

<bundles_post_ra>
// kernel: tpu_custom_call.1
= control target key start
LH: loop header
LB: loop body
LE: loop exit
PB: predicated region body
PF: predicated region fallthrough
CT: control target
= control target key end

     0   :  { %7 = vsyncpa [#allocation3], 0  ;;  %s190_s0 = inlined_call_operand.hbm [shape: f32[8,128], index: 0, kind: input, shape index: {}]   ;;  %s191_s1 = inlined_call_operand.hbm [shape: f32[8,128], index: 1, kind: input, shape index: {}]   ;;  %s192_s2 = inlined_call_operand.hbm [shape: f32[1,24,128], index: 2, kind: output, shape index: {}]  }
   0x1   :  { %8 = vsyncpa [#allocation6], 0 }
   0x2   :  { %9 = vsyncpa [#allocation4], 0  ;;  %s161_s9 = smov [#allocation2]   ;;  %s162_s11 = smov [#allocation5]  }
   0x3   :  { %s19_s10 = sshll.u32 %s161_s9, 4  ;;  %s32_s12 = sshll.u32 %s162_s11, 4  ;;  %s20_s10 = int_to_ptr.vmem [resolvable:$true] %s19_s10  ;;  %s33_s12 = int_to_ptr.vmem [resolvable:$true] %s32_s12 }
   0x4   :  { %s103_s13 = scalar_lea.vmem %s20_s10, 128  ;;  %p108_p1 = scmp.lt.s32.totalorder %s20_s10, %s20_s10 }
   0x5   :  { %p104_p0 = scmp.ne.s32.totalorder %s20_s10, %s103_s13  ;;  %p109_p2 = scmp.lt.s32.totalorder %s103_s13, %s103_s13 }
   0x7   :  { %p110_p3 = por %p109_p2, %p108_p1 }
   0x9   :  { %p111_p4 = pnand %p110_p3, %p104_p0 }
   0xb   :  { %114 = shalt.err (!%p111_p4)
}
   0xc   :  { %22 = dma.hbm_to_vmem [thread:$0]  %s190_s0, 128, %s20_s10, [#allocation3]  }
   0xd   :  { %s123_s16 = scalar_lea.vmem %s33_s12, 128  ;;  %p128_p6 = scmp.lt.s32.totalorder %s33_s12, %s33_s12 }
   0xe   :  { %p124_p5 = scmp.ne.s32.totalorder %s33_s12, %s123_s16  ;;  %p129_p7 = scmp.lt.s32.totalorder %s123_s16, %s123_s16 }
  0x10   :  { %p130_p8 = por %p129_p7, %p128_p6 }
  0x12   :  { %p131_p9 = pnand %p130_p8, %p124_p5 }
  0x14   :  { %134 = shalt.err (!%p131_p9)
}
  0x15   :  { %35 = dma.hbm_to_vmem [thread:$0]  %s191_s1, 128, %s33_s12, [#allocation6]  }
  0x16   :  { %155 = dma.done.wait [#allocation3], 128  }
  0x17   :  { %156 = vsyncadd [#allocation3], 4294967168 }
  0x18   :  { %157 = dma.done.wait [#allocation6], 128  }
  0x19   :  { %158 = vsyncadd [#allocation6], 4294967168  ;;  %s163_s19 = smov [#allocation7]   ;;  %v44_v0 = vld [vmem:[#allocation2] sm:$0xff]  ;;  %v45_v1 = vld [vmem:[#allocation5] sm:$0xff] }
  0x1a   :  { %s77_s20 = sshll.u32 %s163_s19, 4  ;;  %v46_v2 = vmul.f32 %v45_v1, %v44_v0  ;;  %v48_v3 = vmul.f32 %v44_v0, %v44_v0  ;;  %v50_v4 = vmul.f32 %v45_v1, %v45_v1  ;;  %s78_s20 = int_to_ptr.vmem [resolvable:$true] %s77_s20 }
  0x1b   :  { %s135_s0 = scalar_lea.vmem %s78_s20, 384  ;;  %p140_p11 = scmp.lt.s32.totalorder %s78_s20, %s78_s20 }
  0x1c   :  { %56 = vst [vmem:[#allocation7] sm:$0xff] %v46_v2  ;;  %57 = vst [vmem:[#allocation7 + $0x8] sm:$0xff] %v48_v3  ;;  %p136_p10 = scmp.ne.s32.totalorder %s78_s20, %s135_s0  ;;  %p141_p12 = scmp.lt.s32.totalorder %s135_s0, %s135_s0 }
  0x1d   :  { %58 = vst [vmem:[#allocation7 + $0x10] sm:$0xff] %v50_v4 }
  0x1e   :  { %p142_p13 = por %p141_p12, %p140_p11 }
  0x20   :  { %p143_p0 = pnand %p142_p13, %p136_p10 }
  0x22   :  { %146 = shalt.err (!%p143_p0)
}
  0x23   :  { %s164_s1 = smov 128   ;;  %s165_s21 = smov 8  }
  0x24   :  { %83 = dma.vmem_to_hbm [thread:$0]  %s78_s20, 384, %s192_s2, [#allocation4], %s164_s1, %s164_s1, %s165_s21  }
  0x25   :  { %159 = dma.done.wait [#allocation4], 384  }
  0x26   :  { %160 = vsyncadd [#allocation4], 4294966912 }
  0x27   :  { %87 = vsyncpa [#allocation3], 1 }
  0x28   :  { %88 = vsyncpa [#allocation6], 1 }
  0x29   :  { %89 = vsyncpa [#allocation4], 1 }

</bundles_post_ra>
